<compile_context>
chip_gen: v7x
topology: tpu7x:2x2x1
jax: 0.10.0
libtpu: 0.0.40
codegen_flags: <defaults>
</compile_context>

<pallas_src>
import functools

import jax
import jax.numpy as jnp
from jax.experimental import pallas as pl
from jax.experimental.pallas import tpu as pltpu


def _lrelu_bias_kernel(x_ref, b_ref, o_ref, *, pos_scale, neg_scale):
    # x_ref: (TR, TL) tile; b_ref: (TR, 1) per-row bias column.
    x = x_ref[...] + b_ref[...]                       # broadcast bias over lanes
    o_ref[...] = jnp.where(x >= 0, x * pos_scale, x * neg_scale).astype(o_ref.dtype)


def _lrelu_nobias_kernel(x_ref, o_ref, *, pos_scale, neg_scale):
    x = x_ref[...]
    o_ref[...] = jnp.where(x >= 0, x * pos_scale, x * neg_scale).astype(o_ref.dtype)


def _round_up(v, m):
    return ((v + m - 1) // m) * m


def _tile_sizes(n_rows, n_lanes, itemsize):
    """Pick (TR, TL): lane-dense, sublane-aligned, <= ~2 MiB per block buffer."""
    # Lane tile: multiple of 128 (sweet spot 512-1024), or the full (tiny) dim.
    if n_lanes >= 128:
        tl = min(_round_up(n_lanes, 128), 1024)
    else:
        tl = n_lanes                      # full-dim lanes for tiny spatial extents
    # Sublane quantum by dtype width (f32: 8, bf16/f16: 16, int8/fp8: 32).
    if itemsize >= 4:
        sub = 8
    elif itemsize == 2:
        sub = 16
    else:
        sub = 32
    target_tile_bytes = 2 * 1024 * 1024   # per-buffer cap; 2x(in+out) fits easily
    max_rows = max(sub, (target_tile_bytes // (tl * itemsize)) // sub * sub)
    if n_rows >= sub:
        tr = min(_round_up(n_rows, sub), max_rows)
    else:
        tr = n_rows                       # full-dim rows for tiny inputs
    return tr, tl


def fused_leaky_relu_pallas(x, bias=None, negative_slope=0.2, scale=2 ** 0.5):
    """x: (B, C, *spatial) array, bias: (C,) array or None."""
    orig_shape = x.shape
    if x.ndim < 2:
        raise ValueError("expected input of rank >= 2 (B, C, ...)")
    B, C = orig_shape[0], orig_shape[1]
    HW = 1
    for d in orig_shape[2:]:
        HW *= d
    N = B * C

    x2 = x.reshape(N, HW)                 # contiguous -> free reshape
    itemsize = jnp.dtype(x.dtype).itemsize
    TR, TL = _tile_sizes(N, HW, itemsize)
    grid = (pl.cdiv(N, TR), pl.cdiv(HW, TL))

    # Reference hard-codes 0.2 inside F.leaky_relu; scale folded into branches.
    pos_scale = float(scale)
    neg_scale = float(negative_slope) * float(scale)

    compiler_params = pltpu.CompilerParams(
        dimension_semantics=("parallel", "parallel"),
        vmem_limit_bytes=32 * 1024 * 1024,
    )

    if bias is not None:
        # NOTE: bias is cast to x.dtype before the add (mirrors PyTorch .half()
        # behaviour for fp16; a tiny rounding deviation for bf16 inputs).
        bias_rows = jnp.broadcast_to(
            bias.astype(x.dtype).reshape(1, C), (B, C)).reshape(N, 1)
        kernel = functools.partial(
            _lrelu_bias_kernel, pos_scale=pos_scale, neg_scale=neg_scale)
        out = pl.pallas_call(
            kernel,
            out_shape=jax.ShapeDtypeStruct((N, HW), x.dtype),
            grid_spec=pltpu.PrefetchScalarGridSpec(
                num_scalar_prefetch=0,
                grid=grid,
                in_specs=[
                    pl.BlockSpec((TR, TL), lambda r, l: (r, l)),
                    pl.BlockSpec((TR, 1), lambda r, l: (r, 0)),
                ],
                out_specs=pl.BlockSpec((TR, TL), lambda r, l: (r, l)),
            ),
            compiler_params=compiler_params,
        )(x2, bias_rows)
    else:
        kernel = functools.partial(
            _lrelu_nobias_kernel, pos_scale=pos_scale, neg_scale=neg_scale)
        out = pl.pallas_call(
            kernel,
            out_shape=jax.ShapeDtypeStruct((N, HW), x.dtype),
            grid_spec=pltpu.PrefetchScalarGridSpec(
                num_scalar_prefetch=0,
                grid=grid,
                in_specs=[pl.BlockSpec((TR, TL), lambda r, l: (r, l))],
                out_specs=pl.BlockSpec((TR, TL), lambda r, l: (r, l)),
            ),
            compiler_params=compiler_params,
        )(x2)

    return out.reshape(orig_shape)


class FusedLeakyReLU:
    """JAX/Pallas port of the PyTorch FusedLeakyReLU module."""

    def __init__(self, channel, bias=True, negative_slope=0.2, scale=2 ** 0.5):
        # Deterministic init matching nn.Parameter(torch.zeros(channel)).
        self.bias = jnp.zeros((channel,), dtype=jnp.float32) if bias else None
        self.negative_slope = negative_slope
        self.scale = scale

    def __call__(self, x):
        # The reference fused_leaky_relu hard-codes negative_slope=0.2.
        return fused_leaky_relu_pallas(x, self.bias, 0.2, self.scale)


if __name__ == "__main__":
    key = jax.random.PRNGKey(0)
    B, C, H, W = 2, 4, 16, 16
    kx, kb = jax.random.split(key)
    x = jax.random.normal(kx, (B, C, H, W), dtype=jnp.float32)

    # Bias path.
    mod = FusedLeakyReLU(C, bias=True)
    mod.bias = jax.random.normal(kb, (C,), dtype=jnp.float32)
    out = mod(x)
    jax.block_until_ready(out)

    xb = x + mod.bias.reshape(1, C, 1, 1)
    ref = jnp.where(xb >= 0, xb, 0.2 * xb) * (2 ** 0.5)
    assert out.shape == (B, C, H, W)
    assert jnp.allclose(out, ref, atol=1e-6), "bias path mismatch vs reference"

    # No-bias path (skips the bias operand entirely).
    mod_nb = FusedLeakyReLU(C, bias=False)
    out_nb = mod_nb(x)
    jax.block_until_ready(out_nb)
    ref_nb = jnp.where(x >= 0, x, 0.2 * x) * (2 ** 0.5)
    assert jnp.allclose(out_nb, ref_nb, atol=1e-6), "no-bias path mismatch"

    print("KERNEL_OK")
</pallas_src>

<mosaic_0001>
module attributes {stable_mosaic.version = 11 : i64} {
  func.func @_lrelu_bias_kernel(%arg0: i32, %arg1: i32, %arg2: memref<8x256xf32, #tpu.memory_space<vmem>>, %arg3: memref<8x1xf32, #tpu.memory_space<vmem>>, %arg4: memref<8x256xf32, #tpu.memory_space<vmem>>) attributes {dimension_semantics = [#tpu.dimension_semantics<parallel>, #tpu.dimension_semantics<parallel>], iteration_bounds = array<i64: 1, 1>, scalar_prefetch = 0 : i64, scratch_operands = 0 : i64, tpu.core_type = #tpu.core_type<tc>, window_params = [{transform_indices = @transform_0, window_bounds = array<i64: 8, 256>}, {transform_indices = @transform_1, window_bounds = array<i64: 8, 1>}, {transform_indices = @transform_2, window_bounds = array<i64: 8, 256>}]} {
    %c0 = arith.constant 0 : index
    %c0_0 = arith.constant 0 : index
    %0 = vector.load %arg2[%c0, %c0_0] : memref<8x256xf32, #tpu.memory_space<vmem>>, vector<8x256xf32>
    %c0_1 = arith.constant 0 : index
    %c0_2 = arith.constant 0 : index
    %1 = vector.load %arg3[%c0_1, %c0_2] : memref<8x1xf32, #tpu.memory_space<vmem>>, vector<8x1xf32>
    %2 = vector.broadcast %1 : vector<8x1xf32> to vector<8x256xf32>
    %3 = arith.addf %0, %2 : vector<8x256xf32>
    %cst = arith.constant 0.000000e+00 : f32
    %4 = vector.broadcast %cst : f32 to vector<8x256xf32>
    %5 = arith.cmpf oge, %3, %4 : vector<8x256xf32>
    %cst_3 = arith.constant 1.41421354 : f32
    %6 = vector.broadcast %cst_3 : f32 to vector<8x256xf32>
    %7 = arith.mulf %3, %6 : vector<8x256xf32>
    %cst_4 = arith.constant 0.282842726 : f32
    %8 = vector.broadcast %cst_4 : f32 to vector<8x256xf32>
    %9 = arith.mulf %3, %8 : vector<8x256xf32>
    %10 = arith.select %5, %7, %9 : vector<8x256xi1>, vector<8x256xf32>
    %c0_5 = arith.constant 0 : index
    %c0_6 = arith.constant 0 : index
    %11 = vector.load %arg4[%c0_5, %c0_6] : memref<8x256xf32, #tpu.memory_space<vmem>>, vector<8x256xf32>
    tpu.vector_store %arg4[%c0_5, %c0_6], %10 {strides = array<i32>} : memref<8x256xf32, #tpu.memory_space<vmem>>, vector<8x256xf32>,
    return
  }
  func.func @transform_0(%arg0: i32, %arg1: i32) -> (i32, i32) {
    %c0_i32 = arith.constant 0 : i32
    return %arg0, %arg1 : i32, i32
  }
  func.func @transform_1(%arg0: i32, %arg1: i32) -> (i32, i32) {
    %c0_i32 = arith.constant 0 : i32
    %c0_i32_0 = arith.constant 0 : i32
    return %arg0, %c0_i32 : i32, i32
  }
  func.func @transform_2(%arg0: i32, %arg1: i32) -> (i32, i32) {
    %c0_i32 = arith.constant 0 : i32
    return %arg0, %arg1 : i32, i32
  }
}

</mosaic_0001>

<bundles_post_ra>
// kernel: tpu_custom_call.1
= control target key start
LH: loop header
LB: loop body
LE: loop exit
PB: predicated region body
PF: predicated region fallthrough
CT: control target
= control target key end

     0   :  { %7 = vsyncpa [#allocation3], 0  ;;  %s156_s0 = inlined_call_operand.hbm [shape: f32[8,256], index: 0, kind: input, shape index: {}]   ;;  %s157_s1 = inlined_call_operand.vmem [shape: f32[8,1], index: 1, kind: input, shape index: {}]   ;;  %s158_s2 = inlined_call_operand.hbm [shape: f32[8,256], index: 2, kind: output, shape index: {}]  }
   0x1   :  { %8 = vsyncpa [#allocation4], 0  ;;  %s111_s9 = smov [#allocation2]   ;;  %s63_s13 = scalar_lea.hbm %s156_s0, 256 }
   0x2   :  { %s15_s10 = sshll.u32 %s111_s9, 4  ;;  %p64_p0 = scmp.ne.s32.totalorder %s156_s0, %s63_s13  ;;  %s16_s10 = int_to_ptr.vmem [resolvable:$true] %s15_s10 }
   0x3   :  { %p67_p1 = scmp.lt.u32.totalorder %s63_s13, %s156_s0 }
   0x5   :  { %p69_p2 = pnand %p67_p1, %p64_p0 }
   0x7   :  { %72 = shalt.err (!%p69_p2)
}
   0x8   :  { %s73_s18 = scalar_lea.vmem %s16_s10, 256  ;;  %p78_p4 = scmp.lt.s32.totalorder %s16_s10, %s16_s10 }
   0x9   :  { %p74_p3 = scmp.ne.s32.totalorder %s16_s10, %s73_s18  ;;  %p79_p5 = scmp.lt.s32.totalorder %s73_s18, %s73_s18 }
   0xb   :  { %p80_p6 = por %p79_p5, %p78_p4 }
   0xd   :  { %p81_p7 = pnand %p80_p6, %p74_p3 }
   0xf   :  { %84 = shalt.err (!%p81_p7)
}
  0x10   :  { %18 = dma.hbm_to_vmem [thread:$0]  %s156_s0, 256, %s16_s10, [#allocation3]  }
  0x11   :  { %107 = dma.done.wait [#allocation3], 256  }
  0x12   :  { %108 = vsyncadd [#allocation3], 4294967040  ;;  %v112_v0 = vmov 0   ;;  %v26_v1 = vld [vmem:[%s157_s1] sm:$0xff]  ;;  %v25_v3 = vld [vmem:[#allocation2 + $0x8] sm:$0xff]  ;;  %s113_s23 = smov [#allocation5]  }
  0x13   :  { %62 = vset.pattern.permute.xlu0 %v112_v0  ;;  %v24_v2 = vld [vmem:[#allocation2] sm:$0xff]  ;;  %s50_s24 = sshll.u32 %s113_s23, 4  ;;  %s51_s24 = int_to_ptr.vmem [resolvable:$true] %s50_s24 }
  0x14   :  { %29 = vperm.xlu0 %62, %v26_v1   ;;  %s85_s0 = scalar_lea.vmem %s51_s24, 256  ;;  %p90_p9 = scmp.lt.s32.totalorder %s51_s24, %s51_s24 }
  0x15   :  { %p86_p8 = scmp.ne.s32.totalorder %s51_s24, %s85_s0  ;;  %p91_p10 = scmp.lt.s32.totalorder %s85_s0, %s85_s0 }
  0x17   :  { %p92_p11 = por %p91_p10, %p90_p9 }
  0x19   :  { %p93_p12 = pnand %p92_p11, %p86_p8 }
  0x93   :  { %v30_v4 = vpop.permute.xlu0 %29 }
  0x94   :  { %v32_v5 = vadd.f32 %v30_v4, %v24_v2  ;;  %v33_v6 = vadd.f32 %v30_v4, %v25_v3 }
  0x96   :  { %vm34_vm0 = vcmp.ge.f32.partialorder %v32_v5, 0.0  ;;  %vm35_vm1 = vcmp.ge.f32.partialorder %v33_v6, 0.0  ;;  %v36_v7 = vmul.f32 1.4142135, %v32_v5  ;;  %v37_v8 = vmul.f32 1.4142135, %v33_v6 }
  0x97   :  { %v38_v9 = vmul.f32 0.28284273, %v32_v5  ;;  %v39_v10 = vmul.f32 0.28284273, %v33_v6 }
  0x99   :  { %v40_v11 = vsel %vm34_vm0, %v36_v7, %v38_v9  ;;  %v41_v12 = vsel %vm35_vm1, %v37_v8, %v39_v10 }
  0x9a   :  { %42 = vst [vmem:[#allocation5] sm:$0xff] %v40_v11  ;;  %43 = vst [vmem:[#allocation5 + $0x8] sm:$0xff] %v41_v12 }
  0x9b   :  { %96 = shalt.err (!%p93_p12)
}
  0x9c   :  { %s97_s26 = scalar_lea.hbm %s158_s2, 256 }
  0x9d   :  { %p98_p13 = scmp.ne.s32.totalorder %s158_s2, %s97_s26  ;;  %p101_p0 = scmp.lt.u32.totalorder %s97_s26, %s158_s2 }
  0x9f   :  { %p103_p1 = pnand %p101_p0, %p98_p13 }
  0xa1   :  { %106 = shalt.err (!%p103_p1)
}
  0xa2   :  { %53 = dma.vmem_to_hbm [thread:$0]  %s51_s24, 256, %s158_s2, [#allocation4]  }
  0xa3   :  { %109 = dma.done.wait [#allocation4], 256  }
  0xa4   :  { %110 = vsyncadd [#allocation4], 4294967040 }
  0xa5   :  { %57 = vsyncpa [#allocation3], 1 }
  0xa6   :  { %58 = vsyncpa [#allocation4], 1 }

</bundles_post_ra>
